<compile_context>
chip_gen: v5e
topology: v5e:2x2
jax: 0.10.0
libtpu: 0.0.40
codegen_flags: <defaults>
</compile_context>

<pallas_src>
from functools import partial

import numpy as np
import jax
import jax.numpy as jnp
from jax.experimental import pallas as pl
from jax.experimental.pallas import tpu as pltpu

NUM_ELEMENTS = 118
NUM_ROWS     = NUM_ELEMENTS + 1     # zero row prepended (matches F.pad(..., (0,0,1,0)))
NUM_ROWS_PAD = 128                  # table rows padded to 128 (lane-friendly one-hot)
INPUT_DIM    = 3                    # [AtomicMass, AtomicRadius, Electronegativity]
OUT_DIM      = 32                   # proj out_dim
PACK         = 4                    # atoms packed per output row (4 * 32 = 128 lanes)
LANES        = PACK * OUT_DIM       # 128 — lane-dense output width
SPLIT_TERMS  = 3                    # bf16 hi/mid/lo split of the f32 fused table
TMP_MAX      = 2048                 # max packed rows per grid step (= 8192 atoms)
MIN_PALLAS_ATOMS = 4096             # below this, plain XLA gather beats kernel overhead


def make_feature_map():
    """Deterministic synthetic stand-in for periodic_table_v2.csv (normalized columns)."""
    z = np.arange(1, NUM_ELEMENTS + 1, dtype=np.float64)
    mass   = z * 2.3 + np.sin(z) * 0.7
    radius = 250.0 - z * 1.1 + np.cos(z) * 3.0
    en     = 0.7 + 3.3 * np.abs(np.sin(z * 0.37))

    def norm(c):
        return (c - c.min()) / (c.max() - c.min())

    feat = np.stack([norm(mass), norm(radius), norm(en)], axis=1).astype(np.float32)  # (118, 3)
    feat = np.concatenate([np.zeros((1, INPUT_DIM), np.float32), feat], axis=0)       # (119, 3)
    return jnp.asarray(feat)


def build_tables(feature_map, weight, bias):
    """Fold gather table + projection + bias into:
         * fused_f32   : (128, 32)  f32   — used by the small-M XLA fallback
         * table_bf16  : (3*4*128, 128) bf16 — block-diagonal, 3-term bf16 split,
           row block (t*PACK + g)*128 maps group-g one-hots to lanes [g*32,(g+1)*32).
    Computed ONCE, outside the hot path.
    """
    fmap_pad = jnp.zeros((NUM_ROWS_PAD, INPUT_DIM), jnp.float32)
    fmap_pad = fmap_pad.at[:NUM_ROWS, :].set(feature_map.astype(jnp.float32))
    fused = (jnp.dot(fmap_pad, weight.T.astype(jnp.float32),
                     precision=jax.lax.Precision.HIGHEST)
             + bias.astype(jnp.float32)[None, :])                         # (128, 32) f32

    # Exact-to-~2^-24 3-term bf16 decomposition of the f32 table.
    hi  = fused.astype(jnp.bfloat16)
    r1  = fused - hi.astype(jnp.float32)
    mid = r1.astype(jnp.bfloat16)
    r2  = r1 - mid.astype(jnp.float32)
    lo  = r2.astype(jnp.bfloat16)

    eye = jnp.eye(PACK, dtype=jnp.float32)
    blocks = [jnp.kron(eye, t.astype(jnp.float32)).astype(jnp.bfloat16)   # (512, 128) each
              for t in (hi, mid, lo)]
    table_bf16 = jnp.concatenate(blocks, axis=0)                          # (1536, 128)
    return fused, table_bf16


def _tensorcores_per_device():
    """Best-effort TensorCore count per device (v7x: 2, v5e/v6e: 1). Perf-only heuristic."""
    try:
        kind = jax.devices()[0].device_kind.lower()
    except Exception:
        return 1
    if any(tag in kind for tag in ("v4", "v5p", "v7", "7x")):
        return 2
    return 1


def _choose_tiling(mp, num_cores):
    """Pick (rows per grid step, grid steps): 1 step on 1-TC chips when it fits,
    an even multiple of the core count with ~equal tiles otherwise."""
    steps = max(1, pl.cdiv(mp, TMP_MAX))
    if num_cores > 1:
        steps = max(steps, num_cores)
        steps = pl.cdiv(steps, num_cores) * num_cores
    tmp = pl.cdiv(pl.cdiv(mp, steps), 8) * 8
    tmp = min(max(tmp, 8), TMP_MAX)
    return tmp, steps


def atom_encoder_kernel(src_ref, table_ref, out_ref):
    # src_ref  : (tmp, 4)     int32 — 4 atomic numbers per packed row
    # table_ref: (1536, 128)  bf16  — block-diag fused table, 3 bf16 terms (hi/mid/lo)
    # out_ref  : (tmp, 128)   f32   — 4 atoms' 32-wide projections, lane-dense
    tmp = src_ref.shape[0]
    src = src_ref[...]
    row_ids = jax.lax.broadcasted_iota(jnp.int32, (tmp, NUM_ROWS_PAD), 1)   # (tmp, 128)
    acc = jnp.zeros((tmp, LANES), jnp.float32)
    for g in range(PACK):
        # bf16 one-hot is exact (0.0 / 1.0); one group at a time keeps the LHS small
        # and lets the one-hot build of group g+1 overlap the MXU on group g.
        one_hot = (src[:, g:g + 1] == row_ids).astype(jnp.bfloat16)         # (tmp, 128)
        for t in range(SPLIT_TERMS):
            r0 = (t * PACK + g) * NUM_ROWS_PAD
            blk = table_ref[r0:r0 + NUM_ROWS_PAD, :]                        # (128, 128) bf16
            acc = acc + jnp.dot(one_hot, blk, preferred_element_type=jnp.float32)
    out_ref[...] = acc


def atom_feature_encoder(src, fused_f32, table_bf16, *, min_pallas_atoms=MIN_PALLAS_ATOMS):
    """src: (B, N) int atomic numbers in [0, 118]. Returns (B, N, OUT_DIM) f32.

    Note: out-of-range indices (>127 or negative) yield zeros; 119..127 yield
    bias-only rows — the PyTorch gather would error instead.
    """
    B, N = src.shape
    M = B * N
    src = src.astype(jnp.int32)

    if M < min_pallas_atoms:
        # Launch/step overhead dominates at small M — plain XLA fused gather.
        return fused_f32[src]                                                # (B, N, 32)

    mp = pl.cdiv(M, PACK)                                   # packed rows needed
    tmp, steps = _choose_tiling(mp, _tensorcores_per_device())
    mp_pad = steps * tmp
    m_pad = mp_pad * PACK

    src_flat = jnp.pad(src.reshape(M), (0, m_pad - M))      # pad with 0 (valid zero row)
    src_packed = src_flat.reshape(mp_pad, PACK)

    out = pl.pallas_call(
        atom_encoder_kernel,
        out_shape=jax.ShapeDtypeStruct((mp_pad, LANES), jnp.float32),
        grid_spec=pltpu.PrefetchScalarGridSpec(
            num_scalar_prefetch=0,
            grid=(steps,),
            in_specs=[
                pl.BlockSpec((tmp, PACK), lambda i: (i, 0)),                       # packed src rows
                pl.BlockSpec((SPLIT_TERMS * PACK * NUM_ROWS_PAD, LANES),
                             lambda i: (0, 0)),                                    # resident table
            ],
            out_specs=pl.BlockSpec((tmp, LANES), lambda i: (i, 0)),
        ),
        compiler_params=pltpu.CompilerParams(dimension_semantics=("parallel",)),
    )(src_packed, table_bf16)

    # TODO(synk): the (mp,128)->(M,32) re-tiling below costs an extra HBM pass; expose the
    # packed (mp, 128) layout to downstream kernels to avoid it when possible.
    return out.reshape(m_pad, OUT_DIM)[:M].reshape(B, N, OUT_DIM)


if __name__ == "__main__":
    key = jax.random.PRNGKey(0)
    k_src, k_src2, k_w, k_b = jax.random.split(key, 4)

    feature_map = make_feature_map()                                        # (119, 3)
    weight = (jax.random.normal(k_w, (OUT_DIM, INPUT_DIM), jnp.float32)
              * (1.0 / np.sqrt(INPUT_DIM)))                                 # nn.Linear(3, 32).weight
    bias = jax.random.normal(k_b, (OUT_DIM,), jnp.float32) * 0.1            # nn.Linear bias

    # One-time table fusion (hoisted out of the per-call hot path).
    fused_f32, table_bf16 = build_tables(feature_map, weight, bias)
    fused_f32 = jax.block_until_ready(fused_f32)
    table_bf16 = jax.block_until_ready(table_bf16)

    def reference(s):
        feats = feature_map[s].astype(jnp.float32)
        return jnp.dot(feats, weight.T, precision=jax.lax.Precision.HIGHEST) + bias

    # --- small demo shape; force the Pallas path so the kernel actually runs ---
    B, N = 2, 128
    src_small = jax.random.randint(k_src, (B, N), minval=0, maxval=NUM_ROWS, dtype=jnp.int32)
    encode_forced = jax.jit(partial(atom_feature_encoder, min_pallas_atoms=0))
    out_small = jax.block_until_ready(encode_forced(src_small, fused_f32, table_bf16))
    np.testing.assert_allclose(np.asarray(out_small), np.asarray(reference(src_small)),
                               rtol=1e-5, atol=1e-5)

    # --- larger shape exercising the default heuristics (big-tile / multi-step path) ---
    B2, N2 = 4, 2048
    src_big = jax.random.randint(k_src2, (B2, N2), minval=0, maxval=NUM_ROWS, dtype=jnp.int32)
    encode = jax.jit(atom_feature_encoder)
    out_big = jax.block_until_ready(encode(src_big, fused_f32, table_bf16))
    np.testing.assert_allclose(np.asarray(out_big), np.asarray(reference(src_big)),
                               rtol=1e-5, atol=1e-5)

    print("KERNEL_OK")
</pallas_src>

<mosaic_0001>
module attributes {stable_mosaic.version = 11 : i64} {
  func.func @atom_encoder_kernel(%arg0: i32, %arg1: memref<64x4xi32, #tpu.memory_space<vmem>>, %arg2: memref<1536x128xbf16, #tpu.memory_space<vmem>>, %arg3: memref<64x128xf32, #tpu.memory_space<vmem>>) attributes {dimension_semantics = [#tpu.dimension_semantics<parallel>], iteration_bounds = array<i64: 1>, scalar_prefetch = 0 : i64, scratch_operands = 0 : i64, tpu.core_type = #tpu.core_type<tc>, window_params = [{transform_indices = @transform_0, window_bounds = array<i64: 64, 4>}, {pipeline_mode = #tpu.pipeline_mode<synchronous>, transform_indices = @transform_1, window_bounds = array<i64: 1536, 128>}, {transform_indices = @transform_2, window_bounds = array<i64: 64, 128>}]} {
    %c0 = arith.constant 0 : index
    %c0_0 = arith.constant 0 : index
    %0 = vector.load %arg1[%c0, %c0_0] : memref<64x4xi32, #tpu.memory_space<vmem>>, vector<64x4xi32>
    %1 = tpu.iota {dimensions = array<i32: 1>} : vector<64x128xi32>
    %cst = arith.constant 0.000000e+00 : f32
    %2 = vector.broadcast %cst : f32 to vector<64x128xf32>
    %3 = vector.extract_strided_slice %0 {offsets = [0, 0], sizes = [64, 1], strides = [1, 1]} : vector<64x4xi32> to vector<64x1xi32>
    %4 = vector.broadcast %3 : vector<64x1xi32> to vector<64x128xi32>
    %5 = arith.cmpi eq, %4, %1 : vector<64x128xi32>
    %6 = arith.extui %5 : vector<64x128xi1> to vector<64x128xi32>
    %7 = arith.sitofp %6 : vector<64x128xi32> to vector<64x128xf32>
    %8 = arith.truncf %7 : vector<64x128xf32> to vector<64x128xbf16>
    %c0_1 = arith.constant 0 : index
    %c0_2 = arith.constant 0 : index
    %9 = vector.load %arg2[%c0_1, %c0_2] : memref<1536x128xbf16, #tpu.memory_space<vmem>>, vector<128x128xbf16>
    %cst_3 = arith.constant dense<0.000000e+00> : vector<64x128xf32>
    %10 = tpu.matmul %8, %9, %cst_3 {dimension_numbers = #tpu.dot_dimension_numbers<[1], [0], [0], [1], [0, 0, 1, 1], [], []>} : vector<64x128xbf16>, vector<128x128xbf16>, vector<64x128xf32> -> vector<64x128xf32>
    %11 = arith.addf %2, %10 : vector<64x128xf32>
    %c512 = arith.constant 512 : index
    %c0_4 = arith.constant 0 : index
    %12 = vector.load %arg2[%c512, %c0_4] : memref<1536x128xbf16, #tpu.memory_space<vmem>>, vector<128x128xbf16>
    %cst_5 = arith.constant dense<0.000000e+00> : vector<64x128xf32>
    %13 = tpu.matmul %8, %12, %cst_5 {dimension_numbers = #tpu.dot_dimension_numbers<[1], [0], [0], [1], [0, 0, 1, 1], [], []>} : vector<64x128xbf16>, vector<128x128xbf16>, vector<64x128xf32> -> vector<64x128xf32>
    %14 = arith.addf %11, %13 : vector<64x128xf32>
    %c1024 = arith.constant 1024 : index
    %c0_6 = arith.constant 0 : index
    %15 = vector.load %arg2[%c1024, %c0_6] : memref<1536x128xbf16, #tpu.memory_space<vmem>>, vector<128x128xbf16>
    %cst_7 = arith.constant dense<0.000000e+00> : vector<64x128xf32>
    %16 = tpu.matmul %8, %15, %cst_7 {dimension_numbers = #tpu.dot_dimension_numbers<[1], [0], [0], [1], [0, 0, 1, 1], [], []>} : vector<64x128xbf16>, vector<128x128xbf16>, vector<64x128xf32> -> vector<64x128xf32>
    %17 = arith.addf %14, %16 : vector<64x128xf32>
    %18 = vector.extract_strided_slice %0 {offsets = [0, 1], sizes = [64, 1], strides = [1, 1]} : vector<64x4xi32> to vector<64x1xi32>
    %19 = vector.broadcast %18 : vector<64x1xi32> to vector<64x128xi32>
    %20 = arith.cmpi eq, %19, %1 : vector<64x128xi32>
    %21 = arith.extui %20 : vector<64x128xi1> to vector<64x128xi32>
    %22 = arith.sitofp %21 : vector<64x128xi32> to vector<64x128xf32>
    %23 = arith.truncf %22 : vector<64x128xf32> to vector<64x128xbf16>
    %c128 = arith.constant 128 : index
    %c0_8 = arith.constant 0 : index
    %24 = vector.load %arg2[%c128, %c0_8] : memref<1536x128xbf16, #tpu.memory_space<vmem>>, vector<128x128xbf16>
    %cst_9 = arith.constant dense<0.000000e+00> : vector<64x128xf32>
    %25 = tpu.matmul %23, %24, %cst_9 {dimension_numbers = #tpu.dot_dimension_numbers<[1], [0], [0], [1], [0, 0, 1, 1], [], []>} : vector<64x128xbf16>, vector<128x128xbf16>, vector<64x128xf32> -> vector<64x128xf32>
    %26 = arith.addf %17, %25 : vector<64x128xf32>
    %c640 = arith.constant 640 : index
    %c0_10 = arith.constant 0 : index
    %27 = vector.load %arg2[%c640, %c0_10] : memref<1536x128xbf16, #tpu.memory_space<vmem>>, vector<128x128xbf16>
    %cst_11 = arith.constant dense<0.000000e+00> : vector<64x128xf32>
    %28 = tpu.matmul %23, %27, %cst_11 {dimension_numbers = #tpu.dot_dimension_numbers<[1], [0], [0], [1], [0, 0, 1, 1], [], []>} : vector<64x128xbf16>, vector<128x128xbf16>, vector<64x128xf32> -> vector<64x128xf32>
    %29 = arith.addf %26, %28 : vector<64x128xf32>
    %c1152 = arith.constant 1152 : index
    %c0_12 = arith.constant 0 : index
    %30 = vector.load %arg2[%c1152, %c0_12] : memref<1536x128xbf16, #tpu.memory_space<vmem>>, vector<128x128xbf16>
    %cst_13 = arith.constant dense<0.000000e+00> : vector<64x128xf32>
    %31 = tpu.matmul %23, %30, %cst_13 {dimension_numbers = #tpu.dot_dimension_numbers<[1], [0], [0], [1], [0, 0, 1, 1], [], []>} : vector<64x128xbf16>, vector<128x128xbf16>, vector<64x128xf32> -> vector<64x128xf32>
    %32 = arith.addf %29, %31 : vector<64x128xf32>
    %33 = vector.extract_strided_slice %0 {offsets = [0, 2], sizes = [64, 1], strides = [1, 1]} : vector<64x4xi32> to vector<64x1xi32>
    %34 = vector.broadcast %33 : vector<64x1xi32> to vector<64x128xi32>
    %35 = arith.cmpi eq, %34, %1 : vector<64x128xi32>
    %36 = arith.extui %35 : vector<64x128xi1> to vector<64x128xi32>
    %37 = arith.sitofp %36 : vector<64x128xi32> to vector<64x128xf32>
    %38 = arith.truncf %37 : vector<64x128xf32> to vector<64x128xbf16>
    %c256 = arith.constant 256 : index
    %c0_14 = arith.constant 0 : index
    %39 = vector.load %arg2[%c256, %c0_14] : memref<1536x128xbf16, #tpu.memory_space<vmem>>, vector<128x128xbf16>
    %cst_15 = arith.constant dense<0.000000e+00> : vector<64x128xf32>
    %40 = tpu.matmul %38, %39, %cst_15 {dimension_numbers = #tpu.dot_dimension_numbers<[1], [0], [0], [1], [0, 0, 1, 1], [], []>} : vector<64x128xbf16>, vector<128x128xbf16>, vector<64x128xf32> -> vector<64x128xf32>
    %41 = arith.addf %32, %40 : vector<64x128xf32>
    %c768 = arith.constant 768 : index
    %c0_16 = arith.constant 0 : index
    %42 = vector.load %arg2[%c768, %c0_16] : memref<1536x128xbf16, #tpu.memory_space<vmem>>, vector<128x128xbf16>
    %cst_17 = arith.constant dense<0.000000e+00> : vector<64x128xf32>
    %43 = tpu.matmul %38, %42, %cst_17 {dimension_numbers = #tpu.dot_dimension_numbers<[1], [0], [0], [1], [0, 0, 1, 1], [], []>} : vector<64x128xbf16>, vector<128x128xbf16>, vector<64x128xf32> -> vector<64x128xf32>
    %44 = arith.addf %41, %43 : vector<64x128xf32>
    %c1280 = arith.constant 1280 : index
    %c0_18 = arith.constant 0 : index
    %45 = vector.load %arg2[%c1280, %c0_18] : memref<1536x128xbf16, #tpu.memory_space<vmem>>, vector<128x128xbf16>
    %cst_19 = arith.constant dense<0.000000e+00> : vector<64x128xf32>
    %46 = tpu.matmul %38, %45, %cst_19 {dimension_numbers = #tpu.dot_dimension_numbers<[1], [0], [0], [1], [0, 0, 1, 1], [], []>} : vector<64x128xbf16>, vector<128x128xbf16>, vector<64x128xf32> -> vector<64x128xf32>
    %47 = arith.addf %44, %46 : vector<64x128xf32>
    %48 = vector.extract_strided_slice %0 {offsets = [0, 3], sizes = [64, 1], strides = [1, 1]} : vector<64x4xi32> to vector<64x1xi32>
    %49 = vector.broadcast %48 : vector<64x1xi32> to vector<64x128xi32>
    %50 = arith.cmpi eq, %49, %1 : vector<64x128xi32>
    %51 = arith.extui %50 : vector<64x128xi1> to vector<64x128xi32>
    %52 = arith.sitofp %51 : vector<64x128xi32> to vector<64x128xf32>
    %53 = arith.truncf %52 : vector<64x128xf32> to vector<64x128xbf16>
    %c384 = arith.constant 384 : index
    %c0_20 = arith.constant 0 : index
    %54 = vector.load %arg2[%c384, %c0_20] : memref<1536x128xbf16, #tpu.memory_space<vmem>>, vector<128x128xbf16>
    %cst_21 = arith.constant dense<0.000000e+00> : vector<64x128xf32>
    %55 = tpu.matmul %53, %54, %cst_21 {dimension_numbers = #tpu.dot_dimension_numbers<[1], [0], [0], [1], [0, 0, 1, 1], [], []>} : vector<64x128xbf16>, vector<128x128xbf16>, vector<64x128xf32> -> vector<64x128xf32>
    %56 = arith.addf %47, %55 : vector<64x128xf32>
    %c896 = arith.constant 896 : index
    %c0_22 = arith.constant 0 : index
    %57 = vector.load %arg2[%c896, %c0_22] : memref<1536x128xbf16, #tpu.memory_space<vmem>>, vector<128x128xbf16>
    %cst_23 = arith.constant dense<0.000000e+00> : vector<64x128xf32>
    %58 = tpu.matmul %53, %57, %cst_23 {dimension_numbers = #tpu.dot_dimension_numbers<[1], [0], [0], [1], [0, 0, 1, 1], [], []>} : vector<64x128xbf16>, vector<128x128xbf16>, vector<64x128xf32> -> vector<64x128xf32>
    %59 = arith.addf %56, %58 : vector<64x128xf32>
    %c1408 = arith.constant 1408 : index
    %c0_24 = arith.constant 0 : index
    %60 = vector.load %arg2[%c1408, %c0_24] : memref<1536x128xbf16, #tpu.memory_space<vmem>>, vector<128x128xbf16>
    %cst_25 = arith.constant dense<0.000000e+00> : vector<64x128xf32>
    %61 = tpu.matmul %53, %60, %cst_25 {dimension_numbers = #tpu.dot_dimension_numbers<[1], [0], [0], [1], [0, 0, 1, 1], [], []>} : vector<64x128xbf16>, vector<128x128xbf16>, vector<64x128xf32> -> vector<64x128xf32>
    %62 = arith.addf %59, %61 : vector<64x128xf32>
    %c0_26 = arith.constant 0 : index
    %c0_27 = arith.constant 0 : index
    %63 = vector.load %arg3[%c0_26, %c0_27] : memref<64x128xf32, #tpu.memory_space<vmem>>, vector<64x128xf32>
    tpu.vector_store %arg3[%c0_26, %c0_27], %62 {strides = array<i32>} : memref<64x128xf32, #tpu.memory_space<vmem>>, vector<64x128xf32>,
    return
  }
  func.func @transform_0(%arg0: i32) -> (i32, i32) {
    %c0_i32 = arith.constant 0 : i32
    %c0_i32_0 = arith.constant 0 : i32
    return %arg0, %c0_i32 : i32, i32
  }
  func.func @transform_1(%arg0: i32) -> (i32, i32) {
    %c0_i32 = arith.constant 0 : i32
    %c0_i32_0 = arith.constant 0 : i32
    %c0_i32_1 = arith.constant 0 : i32
    return %c0_i32, %c0_i32_0 : i32, i32
  }
  func.func @transform_2(%arg0: i32) -> (i32, i32) {
    %c0_i32 = arith.constant 0 : i32
    %c0_i32_0 = arith.constant 0 : i32
    return %arg0, %c0_i32 : i32, i32
  }
}

</mosaic_0001>

<bundles_post_ra>
// kernel: atom_feature_encoder.1
= control target key start
LH: loop header
LB: loop body
LE: loop exit
PB: predicated region body
PF: predicated region fallthrough
CT: control target
= control target key end

     0   :  { %7 = vsyncpa [#allocation3], 0  ;;  %s2110_s12 = smov [#allocation2]   ;;  %s2111_s14 = smov 64   ;;  %s2454_s0 = inlined_call_operand.vmem [shape: s32[64,4], index: 0, kind: input, shape index: {}]   ;;  %s2455_s1 = inlined_call_operand.hbm [shape: bf16[1536,128], index: 1, kind: input, shape index: {}]   ;;  %s2456_s2 = inlined_call_operand.vmem [shape: f32[64,128], index: 2, kind: output, shape index: {}]  }
   0x1   :  { %s14_s11 = sshll.u32 %s2455_s1, 4  ;;  %s16_s13 = sshll.u32 %s2110_s12, 4  ;;  %s15_s11 = int_to_ptr.hbm [resolvable:$true] %s14_s11  ;;  %s17_s13 = int_to_ptr.vmem [resolvable:$true] %s16_s13 }
   0x2   :  { %s2112_s15 = smov 4  }
   0x3   :  { %22 = dma.hbm_to_vmem [thread:$0]  %s15_s11, 12288, %s17_s13, [#allocation3], %s2111_s14, %s2111_s14, %s2112_s15  }
   0x4   :  { %2108 = dma.done.wait [#allocation3], 12288  }
   0x5   :  { %2109 = vsyncadd [#allocation3], 4294955008  ;;  %v2113_v0 = vmov 1   ;;  %v2114_v1 = vmov 0   ;;  %v2139_v2 = vld [vmem:[%s2454_s0] sm:$0xff]  ;;  %v2146_v3 = vld [vmem:[%s2454_s0 + $0x10] sm:$0xff]  ;;  %v35_v58 = vlaneseq }
   0x6   :  { %2071 = vset.pattern.permute.xlu1 %v2113_v0  ;;  %2070 = vset.pattern.permute.xlu0 %v2114_v1  ;;  %v2152_v4 = vld [vmem:[%s2454_s0 + $0x8] sm:$0xff]  ;;  %v2159_v5 = vld [vmem:[%s2454_s0 + $0x18] sm:$0xff]  ;;  %v2165_v6 = vld [vmem:[%s2454_s0 + $0x20] sm:$0xff]  ;;  %v2115_v17 = vmov 2   ;;  %v2116_v39 = vmov 3  }
   0x7   :  { %2072 = vset.pattern.permute.xlu2 %v2114_v1  ;;  %377 = vperm.xlu1 %2071, %v2139_v2   ;;  %v2173_v7 = vld [vmem:[%s2454_s0 + $0x28] sm:$0xff]  ;;  %v2181_v8 = vld [vmem:[%s2454_s0 + $0x30] sm:$0xff]  ;;  %v2188_v9 = vld [vmem:[%s2454_s0 + $0x38] sm:$0xff]  ;;  %v2208_v63 = vand.u32 127, %v35_v58 }
   0x8   :  { %38 = vperm.xlu0 %2070, %v2139_v2   ;;  %44 = vperm.xlu2 %2072, %v2146_v3   ;;  %v1981_v10 = vld [vmem:[#allocation2 + $0x138] sm:$0xff]  ;;  %v1980_v14 = vld [vmem:[#allocation2 + $0x130] sm:$0xff]  ;;  %v1979_v19 = vld [vmem:[#allocation2 + $0x128] sm:$0xff] }
   0x9   :  { %v1973_v11 = vld [vmem:[#allocation2 + $0x38] sm:$0xff]  ;;  %169 = vmatpush.bf16.msra.mxu0 %v1981_v10  ;;  %v1972_v15 = vld [vmem:[#allocation2 + $0x30] sm:$0xff]  ;;  %v1971_v20 = vld [vmem:[#allocation2 + $0x28] sm:$0xff] }
   0xa   :  { %v1989_v12 = vld [vmem:[#allocation2 + $0x238] sm:$0xff]  ;;  %246 = vmatpush.bf16.msra.mxu1 %v1973_v11  ;;  %v1988_v16 = vld [vmem:[#allocation2 + $0x230] sm:$0xff]  ;;  %v1987_v21 = vld [vmem:[#allocation2 + $0x228] sm:$0xff] }
   0xb   :  { %v1997_v13 = vld [vmem:[#allocation2 + $0x78] sm:$0xff]  ;;  %339 = vmatpush.bf16.msra.mxu2 %v1989_v12  ;;  %v1996_v18 = vld [vmem:[#allocation2 + $0x70] sm:$0xff]  ;;  %v1995_v22 = vld [vmem:[#allocation2 + $0x68] sm:$0xff] }
   0xc   :  { %492 = vmatpush.bf16.msra.mxu3 %v1997_v13  ;;  %v1978_v23 = vld [vmem:[#allocation2 + $0x120] sm:$0xff]  ;;  %v1977_v27 = vld [vmem:[#allocation2 + $0x118] sm:$0xff]  ;;  %v1976_v31 = vld [vmem:[#allocation2 + $0x110] sm:$0xff] }
   0xd   :  { %170 = vmatpush.bf16.msra.mxu0 %v1980_v14  ;;  %v1970_v24 = vld [vmem:[#allocation2 + $0x20] sm:$0xff]  ;;  %v1969_v28 = vld [vmem:[#allocation2 + $0x18] sm:$0xff]  ;;  %v1968_v32 = vld [vmem:[#allocation2 + $0x10] sm:$0xff] }
   0xe   :  { %247 = vmatpush.bf16.msra.mxu1 %v1972_v15  ;;  %v1986_v25 = vld [vmem:[#allocation2 + $0x220] sm:$0xff]  ;;  %v1985_v29 = vld [vmem:[#allocation2 + $0x218] sm:$0xff]  ;;  %v1984_v33 = vld [vmem:[#allocation2 + $0x210] sm:$0xff] }
   0xf   :  { %380 = vperm.xlu1 %2071, %v2152_v4   ;;  %340 = vmatpush.bf16.msra.mxu2 %v1988_v16  ;;  %v1994_v26 = vld [vmem:[#allocation2 + $0x60] sm:$0xff]  ;;  %v1993_v30 = vld [vmem:[#allocation2 + $0x58] sm:$0xff]  ;;  %v1992_v34 = vld [vmem:[#allocation2 + $0x50] sm:$0xff] }
  0x10   :  { %41 = vperm.xlu0 %2070, %v2152_v4   ;;  %47 = vperm.xlu2 %2072, %v2159_v5   ;;  %v1975_v35 = vld [vmem:[#allocation2 + $0x108] sm:$0xff]  ;;  %v1974_v40 = vld [vmem:[#allocation2 + $0x100] sm:$0xff]  ;;  %v2021_v44 = vld [vmem:[#allocation2 + $0xb8] sm:$0xff] }
  0x11   :  { %493 = vmatpush.bf16.msra.mxu3 %v1996_v18  ;;  %171 = vmatpush.bf16.msra.mxu0 %v1979_v19  ;;  %v1967_v36 = vld [vmem:[#allocation2 + $0x8] sm:$0xff]  ;;  %v1966_v41 = vld [vmem:[#allocation2] sm:$0xff]  ;;  %v2005_v45 = vld [vmem:[#allocation2 + $0x178] sm:$0xff] }
  0x12   :  { %248 = vmatpush.bf16.msra.mxu1 %v1971_v20  ;;  %v1983_v37 = vld [vmem:[#allocation2 + $0x208] sm:$0xff]  ;;  %v1982_v42 = vld [vmem:[#allocation2 + $0x200] sm:$0xff]  ;;  %v2029_v46 = vld [vmem:[#allocation2 + $0x1b8] sm:$0xff] }
  0x13   :  { %341 = vmatpush.bf16.msra.mxu2 %v1987_v21  ;;  %v1991_v38 = vld [vmem:[#allocation2 + $0x48] sm:$0xff]  ;;  %v1990_v43 = vld [vmem:[#allocation2 + $0x40] sm:$0xff]  ;;  %v2013_v47 = vld [vmem:[#allocation2 + $0x278] sm:$0xff] }
  0x14   :  { %v2020_v48 = vld [vmem:[#allocation2 + $0xb0] sm:$0xff]  ;;  %v2019_v52 = vld [vmem:[#allocation2 + $0xa8] sm:$0xff]  ;;  %v2018_v59 = vld [vmem:[#allocation2 + $0xa0] sm:$0xff] }
  0x15   :  { %494 = vmatpush.bf16.msra.mxu3 %v1995_v22  ;;  %172 = vmatpush.bf16.msra.mxu0 %v1978_v23  ;;  %v2004_v49 = vld [vmem:[#allocation2 + $0x170] sm:$0xff]  ;;  %v2003_v53 = vld [vmem:[#allocation2 + $0x168] sm:$0xff]  ;;  %v2002_v60 = vld [vmem:[#allocation2 + $0x160] sm:$0xff] }
  0x16   :  { %249 = vmatpush.bf16.msra.mxu1 %v1970_v24  ;;  %v2028_v50 = vld [vmem:[#allocation2 + $0x1b0] sm:$0xff]  ;;  %v2027_v54 = vld [vmem:[#allocation2 + $0x1a8] sm:$0xff]  ;;  %v2026_v61 = vld [vmem:[#allocation2 + $0x1a0] sm:$0xff] }
  0x17   :  { %386 = vperm.xlu1 %2071, %v2159_v5   ;;  %342 = vmatpush.bf16.msra.mxu2 %v1986_v25  ;;  %v2012_v51 = vld [vmem:[#allocation2 + $0x270] sm:$0xff]  ;;  %v2011_v55 = vld [vmem:[#allocation2 + $0x268] sm:$0xff]  ;;  %v2010_v62 = vld [vmem:[#allocation2 + $0x260] sm:$0xff] }
  0x18   :  { %2073 = vset.pattern.permute.xlu0 %v2113_v0  ;;  %50 = vperm.xlu2 %2072, %v2165_v6   ;;  %v2000_v10 = vld [vmem:[#allocation2 + $0x150] sm:$0xff]  ;;  %v2015_v18 = vld [vmem:[#allocation2 + $0x88] sm:$0xff]  ;;  %v2014_v22 = vld [vmem:[#allocation2 + $0x80] sm:$0xff] }
  0x19   :  { %383 = vperm.xlu0 %2073, %v2146_v3   ;;  %495 = vmatpush.bf16.msra.mxu3 %v1994_v26  ;;  %v2024_v11 = vld [vmem:[#allocation2 + $0x190] sm:$0xff]  ;;  %v1999_v19 = vld [vmem:[#allocation2 + $0x148] sm:$0xff]  ;;  %v1998_v23 = vld [vmem:[#allocation2 + $0x140] sm:$0xff] }
  0x1a   :  { %173 = vmatpush.bf16.msra.mxu0 %v1977_v27  ;;  %250 = vmatpush.bf16.msra.mxu1 %v1969_v28  ;;  %v2008_v12 = vld [vmem:[#allocation2 + $0x250] sm:$0xff]  ;;  %v2023_v20 = vld [vmem:[#allocation2 + $0x188] sm:$0xff]  ;;  %v2022_v25 = vld [vmem:[#allocation2 + $0x180] sm:$0xff] }
  0x1b   :  { %343 = vmatpush.bf16.msra.mxu2 %v1985_v29  ;;  %v2007_v21 = vld [vmem:[#allocation2 + $0x248] sm:$0xff]  ;;  %v2006_v26 = vld [vmem:[#allocation2 + $0x240] sm:$0xff]  ;;  %v2048_v58 = vld [vmem:[#allocation2 + $0x1d0] sm:$0xff] }
  0x1d   :  { %496 = vmatpush.bf16.msra.mxu3 %v1993_v30 }
  0x1e   :  { %174 = vmatpush.bf16.msra.mxu0 %v1976_v31  ;;  %251 = vmatpush.bf16.msra.mxu1 %v1968_v32  ;;  %v2053_v31 = vld [vmem:[#allocation2 + $0x1f8] sm:$0xff] }
  0x1f   :  { %2074 = vset.pattern.permute.xlu1 %v2114_v1  ;;  %344 = vmatpush.bf16.msra.mxu2 %v1984_v33  ;;  %v2037_v32 = vld [vmem:[#allocation2 + $0x2b8] sm:$0xff] }
  0x20   :  { %53 = vperm.xlu1 %2074, %v2173_v7   ;;  %2075 = vset.pattern.permute.xlu2 %v2113_v0  ;;  %v2061_v33 = vld [vmem:[#allocation2 + $0x2f8] sm:$0xff] }
  0x21   :  { %392 = vperm.xlu0 %2073, %v2173_v7   ;;  %389 = vperm.xlu2 %2075, %v2165_v6  }
  0x22   :  { %497 = vmatpush.bf16.msra.mxu3 %v1992_v34  ;;  %175 = vmatpush.bf16.msra.mxu0 %v1975_v35  ;;  %v2045_v34 = vld [vmem:[#allocation2 + $0xf8] sm:$0xff]  ;;  %v2052_v35 = vld [vmem:[#allocation2 + $0x1f0] sm:$0xff] }
  0x23   :  { %252 = vmatpush.bf16.msra.mxu1 %v1967_v36  ;;  %345 = vmatpush.bf16.msra.mxu2 %v1983_v37  ;;  %v2036_v36 = vld [vmem:[#allocation2 + $0x2b0] sm:$0xff] }
  0x24   :  { %v2060_v37 = vld [vmem:[#allocation2 + $0x2f0] sm:$0xff] }
  0x26   :  { %498 = vmatpush.bf16.msra.mxu3 %v1991_v38  ;;  %176 = vmatpush.bf16.msra.mxu0 %v1974_v40  ;;  %v2044_v38 = vld [vmem:[#allocation2 + $0xf0] sm:$0xff] }
  0x27   :  { %253 = vmatpush.bf16.msra.mxu1 %v1966_v41  ;;  %346 = vmatpush.bf16.msra.mxu2 %v1982_v42 }
  0x28   :  { %56 = vperm.xlu1 %2074, %v2181_v8  }
  0x29   :  { %395 = vperm.xlu0 %2073, %v2181_v8   ;;  %2076 = vset.pattern.permute.xlu2 %v2114_v1 }
  0x2a   :  { %59 = vperm.xlu2 %2076, %v2188_v9   ;;  %499 = vmatpush.bf16.msra.mxu3 %v1990_v43  ;;  %v2051_v43 = vld [vmem:[#allocation2 + $0x1e8] sm:$0xff] }
  0x2b   :  { %847 = vmatpush.bf16.msrb.mxu2 %v2021_v44  ;;  %593 = vmatpush.bf16.msrb.mxu0 %v2005_v45  ;;  %v2035_v44 = vld [vmem:[#allocation2 + $0x2a8] sm:$0xff] }
  0x2c   :  { %694 = vmatpush.bf16.msrb.mxu1 %v2013_v47  ;;  %v2059_v45 = vld [vmem:[#allocation2 + $0x2e8] sm:$0xff]  ;;  %v2050_v47 = vld [vmem:[#allocation2 + $0x1e0] sm:$0xff] }
  0x2e   :  { %948 = vmatpush.bf16.msrb.mxu3 %v2029_v46  ;;  %v2043_v46 = vld [vmem:[#allocation2 + $0xe8] sm:$0xff] }
  0x2f   :  { %848 = vmatpush.bf16.msrb.mxu2 %v2020_v48  ;;  %594 = vmatpush.bf16.msrb.mxu0 %v2004_v49  ;;  %v2034_v48 = vld [vmem:[#allocation2 + $0x2a0] sm:$0xff] }
  0x30   :  { %2077 = vset.pattern.permute.xlu1 %v2113_v0  ;;  %695 = vmatpush.bf16.msrb.mxu1 %v2012_v51  ;;  %v2058_v49 = vld [vmem:[#allocation2 + $0x2e0] sm:$0xff] }
  0x31   :  { %2079 = vset.pattern.permute.xlu0 %v2115_v17  ;;  %398 = vperm.xlu1 %2077, %v2188_v9  }
  0x32   :  { %735 = vperm.xlu0 %2079, %v2152_v4   ;;  %2078 = vset.pattern.permute.xlu2 %v2115_v17 }
  0x33   :  { %732 = vperm.xlu2 %2078, %v2139_v2   ;;  %949 = vmatpush.bf16.msrb.mxu3 %v2028_v50  ;;  %v2042_v50 = vld [vmem:[#allocation2 + $0xe0] sm:$0xff] }
  0x34   :  { %849 = vmatpush.bf16.msrb.mxu2 %v2019_v52  ;;  %595 = vmatpush.bf16.msrb.mxu0 %v2003_v53 }
  0x35   :  { %696 = vmatpush.bf16.msrb.mxu1 %v2011_v55  ;;  %v2033_v55 = vld [vmem:[#allocation2 + $0x298] sm:$0xff] }
  0x37   :  { %950 = vmatpush.bf16.msrb.mxu3 %v2027_v54  ;;  %v2049_v54 = vld [vmem:[#allocation2 + $0x1d8] sm:$0xff] }
  0x38   :  { %850 = vmatpush.bf16.msrb.mxu2 %v2018_v59  ;;  %596 = vmatpush.bf16.msrb.mxu0 %v2002_v60  ;;  %v2032_v59 = vld [vmem:[#allocation2 + $0x290] sm:$0xff] }
  0x39   :  { %2080 = vset.pattern.permute.xlu1 %v2115_v17  ;;  %697 = vmatpush.bf16.msrb.mxu1 %v2010_v62  ;;  %v2056_v60 = vld [vmem:[#allocation2 + $0x2d0] sm:$0xff] }
  0x3a   :  { %750 = vperm.xlu0 %2079, %v2181_v8   ;;  %738 = vperm.xlu1 %2080, %v2146_v3  }
  0x3b   :  { %741 = vperm.xlu2 %2078, %v2159_v5   ;;  %951 = vmatpush.bf16.msrb.mxu3 %v2026_v61  ;;  %v2040_v61 = vld [vmem:[#allocation2 + $0xd0] sm:$0xff] }
  0x42   :  { %744 = vperm.xlu1 %2080, %v2165_v6   ;;  %2082 = vset.pattern.permute.xlu0 %v2116_v39 }
  0x43   :  { %747 = vperm.xlu2 %2078, %v2173_v7   ;;  %1090 = vperm.xlu0 %2082, %v2152_v4   ;;  %v2117_v4 = vmov 1.0|1.0  }
  0x4a   :  { %753 = vperm.xlu1 %2080, %v2188_v9  }
  0x4b   :  { %2081 = vset.pattern.permute.xlu2 %v2116_v39  ;;  %1105 = vperm.xlu0 %2082, %v2181_v8   ;;  %v2009_v8 = vld [vmem:[#allocation2 + $0x258] sm:$0xff] }
  0x4c   :  { %1087 = vperm.xlu2 %2081, %v2139_v2   ;;  %698 = vmatpush.bf16.msrb.mxu1 %v2009_v8  ;;  %v2030_v8 = vld [vmem:[#allocation2 + $0x280] sm:$0xff] }
  0x50   :  { %699 = vmatpush.bf16.msrb.mxu1 %v2008_v12 }
  0x52   :  { %2083 = vset.pattern.permute.xlu1 %v2116_v39 }
  0x53   :  { %1093 = vperm.xlu1 %2083, %v2146_v3   ;;  %v2031_v3 = vld [vmem:[#allocation2 + $0x288] sm:$0xff] }
  0x54   :  { %1096 = vperm.xlu2 %2081, %v2159_v5   ;;  %v2017_v5 = vld [vmem:[#allocation2 + $0x98] sm:$0xff]  ;;  %700 = vmatpush.bf16.msrb.mxu1 %v2007_v21 }
  0x55   :  { %851 = vmatpush.bf16.msrb.mxu2 %v2017_v5  ;;  %v2055_v5 = vld [vmem:[#allocation2 + $0x2c8] sm:$0xff] }
  0x58   :  { %701 = vmatpush.bf16.msrb.mxu1 %v2006_v26 }
  0x5b   :  { %1099 = vperm.xlu1 %2083, %v2165_v6   ;;  %v2001_v6 = vld [vmem:[#allocation2 + $0x158] sm:$0xff] }
  0x5c   :  { %1102 = vperm.xlu2 %2081, %v2173_v7   ;;  %v2025_v7 = vld [vmem:[#allocation2 + $0x198] sm:$0xff]  ;;  %597 = vmatpush.bf16.msrb.mxu0 %v2001_v6  ;;  %v2039_v6 = vld [vmem:[#allocation2 + $0xc8] sm:$0xff] }
  0x5d   :  { %952 = vmatpush.bf16.msrb.mxu3 %v2025_v7  ;;  %v2046_v7 = vld [vmem:[#allocation2 + $0x1c0] sm:$0xff] }
  0x60   :  { %598 = vmatpush.bf16.msrb.mxu0 %v2000_v10  ;;  %v2038_v10 = vld [vmem:[#allocation2 + $0xc0] sm:$0xff] }
  0x61   :  { %953 = vmatpush.bf16.msrb.mxu3 %v2024_v11 }
  0x62   :  { %v45_v0 = vpop.permute.xlu2 %44 }
  0x63   :  { %1108 = vperm.xlu1 %2083, %v2188_v9   ;;  %v2016_v9 = vld [vmem:[#allocation2 + $0x90] sm:$0xff]  ;;  %vm63_vm8 = vcmp.eq.s32.totalorder %v45_v0, %v2208_v63 }
  0x64   :  { %852 = vmatpush.bf16.msrb.mxu2 %v2016_v9  ;;  %599 = vmatpush.bf16.msrb.mxu0 %v1999_v19  ;;  %v2054_v9 = vld [vmem:[#allocation2 + $0x2c0] sm:$0xff] }
  0x65   :  { %954 = vmatpush.bf16.msrb.mxu3 %v2023_v20 }
  0x68   :  { %853 = vmatpush.bf16.msrb.mxu2 %v2015_v18  ;;  %600 = vmatpush.bf16.msrb.mxu0 %v1998_v23 }
  0x69   :  { %955 = vmatpush.bf16.msrb.mxu3 %v2022_v25 }
  0x6a   :  { %v48_v13 = vpop.permute.xlu2 %47 }
  0x6b   :  { %vm64_vm9 = vcmp.eq.s32.totalorder %v48_v13, %v2208_v63 }
  0x6c   :  { %vm1496_vm11 = vmpackc.low %vm64_vm9, %vm63_vm8  ;;  %854 = vmatpush.bf16.msrb.mxu2 %v2014_v22 }
  0x72   :  { %v51_v17 = vpop.permute.xlu2 %50 }
  0x73   :  { %vm65_vm15 = vcmp.eq.s32.totalorder %v51_v17, %v2208_v63 }
  0x79   :  { %v378_v56 = vpop.permute.xlu1 %377 }
  0x7a   :  { %v39_v57 = vpop.permute.xlu0 %38  ;;  %vm400_vm0 = vcmp.eq.s32.totalorder %v378_v56, %v2208_v63  ;;  %v2057_v56 = vld [vmem:[#allocation2 + $0x2d8] sm:$0xff] }
  0x7b   :  { %vm61_vm3 = vcmp.eq.s32.totalorder %v39_v57, %v2208_v63  ;;  %v390_v28 = vpop.permute.xlu2 %389  ;;  %v2041_v57 = vld [vmem:[#allocation2 + $0xd8] sm:$0xff] }
  0x7c   :  { %vm404_vm13 = vcmp.eq.s32.totalorder %v390_v28, %v2208_v63 }
  0x81   :  { %v381_v1 = vpop.permute.xlu1 %380 }
  0x82   :  { %v42_v2 = vpop.permute.xlu0 %41  ;;  %vm401_vm1 = vcmp.eq.s32.totalorder %v381_v1, %v2208_v63 }
  0x83   :  { %vm62_vm2 = vcmp.eq.s32.totalorder %v42_v2, %v2208_v63  ;;  %vm2214_vm4 = vmpackc.low %vm401_vm1, %vm400_vm0  ;;  %v2047_v2 = vld [vmem:[#allocation2 + $0x1c8] sm:$0xff] }
  0x84   :  { %vm1494_vm5 = vmpackc.low %vm62_vm2, %vm61_vm3  ;;  %1623 = vmatmul.msk.bf16.vlgmr.msra.gmra.mxu3 %vm2214_vm4, %v2117_v4  ;;  %v60_v40 = vpop.permute.xlu2 %59 }
  0x85   :  { %1495 = vmatmul.msk.bf16.vlgmr.msra.gmra.mxu0 %vm1494_vm5, %v2117_v4  ;;  %1535 = vmatmul.msk.bf16.vlgmr.msra.gmra.mxu1 %vm1494_vm5, %v2117_v4 }
  0x86   :  { %1575 = vmatmul.msk.bf16.vlgmr.msra.gmra.mxu2 %vm1494_vm5, %v2117_v4  ;;  %1049 = vmatpush.bf16.msra.mxu0 %v2037_v32  ;;  %vm68_vm5 = vcmp.eq.s32.totalorder %v60_v40, %v2208_v63 }
  0x87   :  { %1303 = vmatpush.bf16.msra.mxu2 %v2053_v31  ;;  %1404 = vmatpush.bf16.msra.mxu3 %v2061_v33 }
  0x88   :  { %1202 = vmatpush.bf16.msra.mxu1 %v2045_v34 }
  0x89   :  { %v387_v14 = vpop.permute.xlu1 %386 }
  0x8a   :  { %vm403_vm6 = vcmp.eq.s32.totalorder %v387_v14, %v2208_v63  ;;  %1050 = vmatpush.bf16.msra.mxu0 %v2036_v36 }
  0x8b   :  { %v384_v15 = vpop.permute.xlu0 %383  ;;  %1304 = vmatpush.bf16.msra.mxu2 %v2052_v35  ;;  %1405 = vmatpush.bf16.msra.mxu3 %v2060_v37 }
  0x8c   :  { %vm402_vm7 = vcmp.eq.s32.totalorder %v384_v15, %v2208_v63  ;;  %1203 = vmatpush.bf16.msra.mxu1 %v2044_v38 }
  0x8d   :  { %vm2228_vm10 = vmpackc.low %vm403_vm6, %vm402_vm7  ;;  %v733_v51 = vpop.permute.xlu2 %732 }
  0x8e   :  { %1051 = vmatpush.bf16.msra.mxu0 %v2035_v44  ;;  %vm755_vm9 = vcmp.eq.s32.totalorder %v733_v51, %v2208_v63 }
  0x8f   :  { %1305 = vmatpush.bf16.msra.mxu2 %v2051_v43  ;;  %1406 = vmatpush.bf16.msra.mxu3 %v2059_v45 }
  0x90   :  { %1204 = vmatpush.bf16.msra.mxu1 %v2043_v46 }
  0x92   :  { %v54_v24 = vpop.permute.xlu1 %53  ;;  %1052 = vmatpush.bf16.msra.mxu0 %v2034_v48 }
  0x93   :  { %v393_v27 = vpop.permute.xlu0 %392  ;;  %vm66_vm14 = vcmp.eq.s32.totalorder %v54_v24, %v2208_v63  ;;  %1306 = vmatpush.bf16.msra.mxu2 %v2050_v47  ;;  %1407 = vmatpush.bf16.msra.mxu3 %v2058_v49 }
  0x94   :  { %1625 = vmatmul.msk.bf16.gmra.mxu3 %vm2228_vm10, %v2117_v4  ;;  %vm405_vm12 = vcmp.eq.s32.totalorder %v393_v27, %v2208_v63  ;;  %vm1498_vm1 = vmpackc.low %vm66_vm14, %vm65_vm15  ;;  %1205 = vmatpush.bf16.msra.mxu1 %v2042_v50 }
  0x95   :  { %1497 = vmatmul.msk.bf16.gmra.mxu0 %vm1496_vm11, %v2117_v4  ;;  %1537 = vmatmul.msk.bf16.gmra.mxu1 %vm1496_vm11, %v2117_v4  ;;  %vm2242_vm0 = vmpackc.low %vm405_vm12, %vm404_vm13  ;;  %v742_v0 = vpop.permute.xlu2 %741 }
  0x96   :  { %1577 = vmatmul.msk.bf16.gmra.mxu2 %vm1496_vm11, %v2117_v4  ;;  %1053 = vmatpush.bf16.msra.mxu0 %v2033_v55  ;;  %vm758_vm13 = vcmp.eq.s32.totalorder %v742_v0, %v2208_v63 }
  0x97   :  { %1307 = vmatpush.bf16.msra.mxu2 %v2049_v54  ;;  %1408 = vmatpush.bf16.msra.mxu3 %v2057_v56 }
  0x98   :  { %1206 = vmatpush.bf16.msra.mxu1 %v2041_v57 }
  0x9a   :  { %v57_v30 = vpop.permute.xlu1 %56  ;;  %1054 = vmatpush.bf16.msra.mxu0 %v2032_v59 }
  0x9b   :  { %v396_v41 = vpop.permute.xlu0 %395  ;;  %vm67_vm3 = vcmp.eq.s32.totalorder %v57_v30, %v2208_v63  ;;  %1308 = vmatpush.bf16.msra.mxu2 %v2048_v58  ;;  %1409 = vmatpush.bf16.msra.mxu3 %v2056_v60 }
  0x9c   :  { %vm406_vm6 = vcmp.eq.s32.totalorder %v396_v41, %v2208_v63  ;;  %vm1500_vm8 = vmpackc.low %vm68_vm5, %vm67_vm3  ;;  %1207 = vmatpush.bf16.msra.mxu1 %v2040_v61 }
  0x9d   :  { %v748_v11 = vpop.permute.xlu2 %747 }
  0x9e   :  { %1055 = vmatpush.bf16.msra.mxu0 %v2031_v3  ;;  %vm760_vm15 = vcmp.eq.s32.totalorder %v748_v11, %v2208_v63 }
  0x9f   :  { %1309 = vmatpush.bf16.msra.mxu2 %v2047_v2  ;;  %1410 = vmatpush.bf16.msra.mxu3 %v2055_v5 }
  0xa0   :  { %1208 = vmatpush.bf16.msra.mxu1 %v2039_v6 }
  0xa2   :  { %1056 = vmatpush.bf16.msra.mxu0 %v2030_v8 }
  0xa3   :  { %v399_v39 = vpop.permute.xlu1 %398  ;;  %1310 = vmatpush.bf16.msra.mxu2 %v2046_v7  ;;  %1411 = vmatpush.bf16.msra.mxu3 %v2054_v9 }
  0xa4   :  { %1627 = vmatmul.msk.bf16.gmra.mxu3 %vm2242_vm0, %v2117_v4  ;;  %vm407_vm2 = vcmp.eq.s32.totalorder %v399_v39, %v2208_v63  ;;  %v736_v52 = vpop.permute.xlu0 %735  ;;  %1209 = vmatpush.bf16.msra.mxu1 %v2038_v10 }
  0xa5   :  { %1499 = vmatmul.msk.bf16.gmra.mxu0 %vm1498_vm1, %v2117_v4  ;;  %1539 = vmatmul.msk.bf16.gmra.mxu1 %vm1498_vm1, %v2117_v4  ;;  %vm2256_vm7 = vmpackc.low %vm407_vm2, %vm406_vm6  ;;  %vm756_vm11 = vcmp.eq.s32.totalorder %v736_v52, %v2208_v63 }
  0xa6   :  { %1579 = vmatmul.msk.bf16.gmra.mxu2 %vm1498_vm1, %v2117_v4  ;;  %vm2268_vm12 = vmpackc.low %vm756_vm11, %vm755_vm9  ;;  %v1088_v17 = vpop.permute.xlu2 %1087 }
  0xac   :  { %v739_v62 = vpop.permute.xlu1 %738  ;;  %v751_v15 = vpop.permute.xlu0 %750 }
  0xad   :  { %vm761_vm3 = vcmp.eq.s32.totalorder %v751_v15, %v2208_v63 }
  0xae   :  { %v1097_v30 = vpop.permute.xlu2 %1096 }
  0xaf   :  { %vm1113_vm9 = vcmp.eq.s32.totalorder %v1097_v30, %v2208_v63 }
  0xb4   :  { %1629 = vmatmul.msk.bf16.gmra.mxu3 %vm2256_vm7, %v2117_v4  ;;  %v745_v12 = vpop.permute.xlu1 %744 }
  0xb5   :  { %1501 = vmatmul.msk.bf16.gmra.mxu0 %vm1500_vm8, %v2117_v4  ;;  %1541 = vmatmul.msk.bf16.gmra.mxu1 %vm1500_vm8, %v2117_v4  ;;  %v1091_v18 = vpop.permute.xlu0 %1090 }
  0xb6   :  { %1581 = vmatmul.msk.bf16.gmra.mxu2 %vm1500_vm8, %v2117_v4  ;;  %vm1111_vm6 = vcmp.eq.s32.totalorder %v1091_v18, %v2208_v63  ;;  %v1103_v45 = vpop.permute.xlu2 %1102 }
  0xbc   :  { %v754_v14 = vpop.permute.xlu1 %753 }
  0xbd   :  { %vm762_vm2 = vcmp.eq.s32.totalorder %v754_v14, %v2208_v63 }
  0xbe   :  { %vm2322_vm5 = vmpackc.low %vm762_vm2, %vm761_vm3 }
  0xc4   :  { %1791 = vmatmul.msk.bf16.vlgmr.msrb.gmra.mxu3 %vm2268_vm12, %v2117_v4 }
  0xc5   :  { %1663 = vmatmul.msk.bf16.vlgmr.msrb.gmra.mxu0 %vm2214_vm4, %v2117_v4  ;;  %1703 = vmatmul.msk.bf16.vlgmr.msrb.gmra.mxu1 %vm2214_vm4, %v2117_v4  ;;  %vm757_vm4 = vcmp.eq.s32.totalorder %v739_v62, %v2208_v63  ;;  %v1094_v29 = vpop.permute.xlu1 %1093  ;;  %v1106_v62 = vpop.permute.xlu0 %1105 }
  0xc6   :  { %1751 = vmatmul.msk.bf16.vlgmr.msrb.gmra.mxu2 %vm2268_vm12, %v2117_v4  ;;  %vm2286_vm14 = vmpackc.low %vm758_vm13, %vm757_vm4  ;;  %vm1115_vm4 = vcmp.eq.s32.totalorder %v1103_v45, %v2208_v63 }
  0xcd   :  { %v1100_v46 = vpop.permute.xlu1 %1099 }
  0xd4   :  { %1793 = vmatmul.msk.bf16.gmra.mxu3 %vm2286_vm14, %v2117_v4 }
  0xd5   :  { %1665 = vmatmul.msk.bf16.gmra.mxu0 %vm2228_vm10, %v2117_v4  ;;  %1705 = vmatmul.msk.bf16.gmra.mxu1 %vm2228_vm10, %v2117_v4  ;;  %vm759_vm10 = vcmp.eq.s32.totalorder %v745_v12, %v2208_v63  ;;  %v1109_v61 = vpop.permute.xlu1 %1108 }
  0xd6   :  { %1753 = vmatmul.msk.bf16.gmra.mxu2 %vm2286_vm14, %v2117_v4  ;;  %vm2304_vm1 = vmpackc.low %vm760_vm15, %vm759_vm10  ;;  %vm1116_vm10 = vcmp.eq.s32.totalorder %v1106_v62, %v2208_v63 }
  0xe4   :  { %1795 = vmatmul.msk.bf16.gmra.mxu3 %vm2304_vm1, %v2117_v4 }
  0xe5   :  { %1667 = vmatmul.msk.bf16.gmra.mxu0 %vm2242_vm0, %v2117_v4  ;;  %1707 = vmatmul.msk.bf16.gmra.mxu1 %vm2242_vm0, %v2117_v4  ;;  %vm1110_vm0 = vcmp.eq.s32.totalorder %v1088_v17, %v2208_v63 }
  0xe6   :  { %1755 = vmatmul.msk.bf16.gmra.mxu2 %vm2304_vm1, %v2117_v4  ;;  %vm1878_vm8 = vmpackc.low %vm1111_vm6, %vm1110_vm0 }
  0xf4   :  { %1797 = vmatmul.msk.bf16.gmra.mxu3 %vm2322_vm5, %v2117_v4 }
  0xf5   :  { %1669 = vmatmul.msk.bf16.gmra.mxu0 %vm2256_vm7, %v2117_v4  ;;  %1709 = vmatmul.msk.bf16.gmra.mxu1 %vm2256_vm7, %v2117_v4  ;;  %vm1112_vm7 = vcmp.eq.s32.totalorder %v1094_v29, %v2208_v63 }
  0xf6   :  { %1757 = vmatmul.msk.bf16.gmra.mxu2 %vm2322_vm5, %v2117_v4  ;;  %vm1880_vm11 = vmpackc.low %vm1113_vm9, %vm1112_vm7 }
 0x102   :  { %v178_v19 = vpop.f32.mrf.mxu0  ;;  %v255_v20 = vpop.f32.mrf.mxu1 }
 0x103   :  { %v256_v21 = vadd.f32 %v255_v20, %v178_v19 }
 0x104   :  { %1959 = vmatmul.msk.bf16.vlgmr.msra.gmra.mxu3 %vm1878_vm8, %v2117_v4 }
 0x105   :  { %1831 = vmatmul.msk.bf16.vlgmr.msra.gmra.mxu0 %vm2268_vm12, %v2117_v4  ;;  %1879 = vmatmul.msk.bf16.vlgmr.msra.gmra.mxu1 %vm1878_vm8, %v2117_v4  ;;  %vm1114_vm12 = vcmp.eq.s32.totalorder %v1100_v46, %v2208_v63 }
 0x106   :  { %1919 = vmatmul.msk.bf16.vlgmr.msra.gmra.mxu2 %vm1878_vm8, %v2117_v4  ;;  %vm1882_vm13 = vmpackc.low %vm1115_vm4, %vm1114_vm12 }
 0x107   :  { %v501_v22 = vpop.f32.mrf.mxu3 }
 0x109   :  { %v348_v23 = vpop.f32.mrf.mxu2 }
 0x10a   :  { %v368_v24 = vadd.f32 %v348_v23, %v256_v21  ;;  %v180_v25 = vpop.f32.mrf.mxu0  ;;  %v257_v26 = vpop.f32.mrf.mxu1 }
 0x10b   :  { %v258_v27 = vadd.f32 %v257_v26, %v180_v25 }
 0x10c   :  { %v2346_v28 = vadd.f32 %v501_v22, %v368_v24 }
 0x10f   :  { %v503_v31 = vpop.f32.mrf.mxu3 }
 0x111   :  { %v350_v32 = vpop.f32.mrf.mxu2 }
 0x112   :  { %v369_v33 = vadd.f32 %v350_v32, %v258_v27  ;;  %v183_v34 = vpop.f32.mrf.mxu0  ;;  %v260_v35 = vpop.f32.mrf.mxu1 }
 0x113   :  { %v261_v36 = vadd.f32 %v260_v35, %v183_v34 }
 0x114   :  { %v2350_v37 = vadd.f32 %v503_v31, %v369_v33  ;;  %1961 = vmatmul.msk.bf16.gmra.mxu3 %vm1880_vm11, %v2117_v4 }
 0x115   :  { %1833 = vmatmul.msk.bf16.gmra.mxu0 %vm2286_vm14, %v2117_v4  ;;  %1881 = vmatmul.msk.bf16.gmra.mxu1 %vm1880_vm11, %v2117_v4  ;;  %vm1117_vm14 = vcmp.eq.s32.totalorder %v1109_v61, %v2208_v63 }
 0x116   :  { %1921 = vmatmul.msk.bf16.gmra.mxu2 %vm1880_vm11, %v2117_v4  ;;  %vm1884_vm15 = vmpackc.low %vm1117_vm14, %vm1116_vm10 }
 0x117   :  { %v506_v38 = vpop.f32.mrf.mxu3 }
 0x119   :  { %v353_v39 = vpop.f32.mrf.mxu2 }
 0x11a   :  { %v370_v40 = vadd.f32 %v353_v39, %v261_v36  ;;  %v185_v41 = vpop.f32.mrf.mxu0  ;;  %v262_v42 = vpop.f32.mrf.mxu1 }
 0x11b   :  { %v263_v43 = vadd.f32 %v262_v42, %v185_v41 }
 0x11c   :  { %v2358_v44 = vadd.f32 %v506_v38, %v370_v40 }
 0x11f   :  { %v508_v47 = vpop.f32.mrf.mxu3 }
 0x121   :  { %v355_v48 = vpop.f32.mrf.mxu2 }
 0x122   :  { %v371_v49 = vadd.f32 %v355_v48, %v263_v43  ;;  %v188_v50 = vpop.f32.mrf.mxu0  ;;  %v265_v51 = vpop.f32.mrf.mxu1 }
 0x123   :  { %v266_v52 = vadd.f32 %v265_v51, %v188_v50 }
 0x124   :  { %v2362_v53 = vadd.f32 %v508_v47, %v371_v49  ;;  %1963 = vmatmul.msk.bf16.gmra.mxu3 %vm1882_vm13, %v2117_v4 }
 0x125   :  { %1835 = vmatmul.msk.bf16.gmra.mxu0 %vm2304_vm1, %v2117_v4  ;;  %1883 = vmatmul.msk.bf16.gmra.mxu1 %vm1882_vm13, %v2117_v4 }
 0x126   :  { %1923 = vmatmul.msk.bf16.gmra.mxu2 %vm1882_vm13, %v2117_v4 }
 0x127   :  { %v511_v54 = vpop.f32.mrf.mxu3 }
 0x129   :  { %v358_v55 = vpop.f32.mrf.mxu2 }
 0x12a   :  { %v372_v56 = vadd.f32 %v358_v55, %v266_v52  ;;  %v190_v57 = vpop.f32.mrf.mxu0  ;;  %v267_v58 = vpop.f32.mrf.mxu1 }
 0x12b   :  { %v268_v59 = vadd.f32 %v267_v58, %v190_v57 }
 0x12c   :  { %v2370_v60 = vadd.f32 %v511_v54, %v372_v56 }
 0x12f   :  { %v513_v0 = vpop.f32.mrf.mxu3 }
 0x131   :  { %v360_v1 = vpop.f32.mrf.mxu2 }
 0x132   :  { %v373_v2 = vadd.f32 %v360_v1, %v268_v59  ;;  %v193_v3 = vpop.f32.mrf.mxu0  ;;  %v270_v5 = vpop.f32.mrf.mxu1 }
 0x133   :  { %v271_v6 = vadd.f32 %v270_v5, %v193_v3 }
 0x134   :  { %v2374_v7 = vadd.f32 %v513_v0, %v373_v2  ;;  %1965 = vmatmul.msk.bf16.gmra.mxu3 %vm1884_vm15, %v2117_v4 }
 0x135   :  { %1837 = vmatmul.msk.bf16.gmra.mxu0 %vm2322_vm5, %v2117_v4  ;;  %1885 = vmatmul.msk.bf16.gmra.mxu1 %vm1884_vm15, %v2117_v4 }
 0x136   :  { %1925 = vmatmul.msk.bf16.gmra.mxu2 %vm1884_vm15, %v2117_v4 }
 0x137   :  { %v516_v8 = vpop.f32.mrf.mxu3 }
 0x139   :  { %v363_v63 = vpop.f32.mrf.mxu2 }
 0x13a   :  { %v374_v9 = vadd.f32 %v363_v63, %v271_v6  ;;  %v195_v10 = vpop.f32.mrf.mxu0  ;;  %v272_v11 = vpop.f32.mrf.mxu1 }
 0x13b   :  { %v273_v12 = vadd.f32 %v272_v11, %v195_v10 }
 0x13c   :  { %v2382_v13 = vadd.f32 %v516_v8, %v374_v9 }
 0x13f   :  { %v518_v14 = vpop.f32.mrf.mxu3 }
 0x141   :  { %v365_v15 = vpop.f32.mrf.mxu2 }
 0x142   :  { %v375_v17 = vadd.f32 %v365_v15, %v273_v12  ;;  %v602_v18 = vpop.f32.mrf.mxu0  ;;  %v703_v19 = vpop.f32.mrf.mxu1 }
 0x143   :  { %v622_v47 = vadd.f32 %v602_v18, %v2346_v28 }
 0x144   :  { %v2384_v20 = vadd.f32 %v518_v14, %v375_v17 }
 0x145   :  { %v723_v51 = vadd.f32 %v703_v19, %v622_v47 }
 0x147   :  { %v957_v16 = vpop.f32.mrf.mxu3 }
 0x149   :  { %v856_v21 = vpop.f32.mrf.mxu2 }
 0x14a   :  { %v604_v22 = vpop.f32.mrf.mxu0  ;;  %v705_v23 = vpop.f32.mrf.mxu1  ;;  %v876_v52 = vadd.f32 %v856_v21, %v723_v51 }
 0x14b   :  { %v623_v55 = vadd.f32 %v604_v22, %v2350_v37 }
 0x14c   :  { %v977_v57 = vadd.f32 %v957_v16, %v876_v52 }
 0x14d   :  { %v724_v61 = vadd.f32 %v705_v23, %v623_v55 }
 0x14f   :  { %v959_v4 = vpop.f32.mrf.mxu3 }
 0x151   :  { %v858_v24 = vpop.f32.mrf.mxu2 }
 0x152   :  { %v607_v25 = vpop.f32.mrf.mxu0  ;;  %v708_v26 = vpop.f32.mrf.mxu1  ;;  %v877_v28 = vadd.f32 %v858_v24, %v724_v61 }
 0x153   :  { %v624_v1 = vadd.f32 %v607_v25, %v2358_v44 }
 0x154   :  { %v978_v5 = vadd.f32 %v959_v4, %v877_v28 }
 0x155   :  { %v725_v9 = vadd.f32 %v708_v26, %v624_v1 }
 0x157   :  { %v962_v27 = vpop.f32.mrf.mxu3 }
 0x159   :  { %v861_v29 = vpop.f32.mrf.mxu2 }
 0x15a   :  { %v609_v30 = vpop.f32.mrf.mxu0  ;;  %v710_v31 = vpop.f32.mrf.mxu1  ;;  %v878_v11 = vadd.f32 %v861_v29, %v725_v9 }
 0x15b   :  { %v625_v14 = vadd.f32 %v609_v30, %v2362_v53 }
 0x15c   :  { %v979_v44 = vadd.f32 %v962_v27, %v878_v11 }
 0x15d   :  { %v726_v21 = vadd.f32 %v710_v31, %v625_v14 }
 0x15f   :  { %v964_v32 = vpop.f32.mrf.mxu3 }
 0x161   :  { %v863_v33 = vpop.f32.mrf.mxu2 }
 0x162   :  { %v612_v34 = vpop.f32.mrf.mxu0  ;;  %v713_v35 = vpop.f32.mrf.mxu1  ;;  %v879_v4 = vadd.f32 %v863_v33, %v726_v21 }
 0x163   :  { %v626_v25 = vadd.f32 %v612_v34, %v2370_v60 }
 0x164   :  { %v980_v53 = vadd.f32 %v964_v32, %v879_v4 }
 0x165   :  { %v727_v51 = vadd.f32 %v713_v35, %v626_v25 }
 0x167   :  { %v2386_v36 = vpop.f32.mrf.mxu3 }
 0x169   :  { %v866_v38 = vpop.f32.mrf.mxu2 }
 0x16a   :  { %v614_v39 = vpop.f32.mrf.mxu0  ;;  %v2388_v40 = vpop.f32.mrf.mxu1  ;;  %v880_v31 = vadd.f32 %v866_v38, %v727_v51 }
 0x16c   :  { %v981_v60 = vadd.f32 %v2386_v36, %v880_v31 }
 0x16f   :  { %v2390_v41 = vpop.f32.mrf.mxu3 }
 0x171   :  { %v2392_v42 = vpop.f32.mrf.mxu2 }
 0x172   :  { %v2394_v43 = vpop.f32.mrf.mxu0  ;;  %v2396_v45 = vpop.f32.mrf.mxu1 }
 0x177   :  { %v2398_v46 = vpop.f32.mrf.mxu3 }
 0x179   :  { %v2401_v48 = vpop.f32.mrf.mxu2 }
 0x17a   :  { %v2403_v49 = vpop.f32.mrf.mxu0  ;;  %v2405_v50 = vpop.f32.mrf.mxu1 }
 0x17f   :  { %v2407_v54 = vpop.f32.mrf.mxu3 }
 0x181   :  { %v2410_v56 = vpop.f32.mrf.mxu2 }
 0x182   :  { %v1058_v58 = vpop.f32.mrf.mxu0  ;;  %v1211_v59 = vpop.f32.mrf.mxu1 }
 0x183   :  { %v1078_v62 = vadd.f32 %v1058_v58, %v977_v57  ;;  %v627_v57 = vadd.f32 %v614_v39, %v2374_v7  ;;  %v628_v7 = vadd.f32 %v2394_v43, %v2382_v13  ;;  %v629_v13 = vadd.f32 %v2403_v49, %v2384_v20 }
 0x185   :  { %v1231_v2 = vadd.f32 %v1211_v59, %v1078_v62  ;;  %v728_v62 = vadd.f32 %v2388_v40, %v627_v57  ;;  %v729_v40 = vadd.f32 %v2396_v45, %v628_v7  ;;  %v730_v45 = vadd.f32 %v2405_v50, %v629_v13 }
 0x187   :  { %v1413_v0 = vpop.f32.mrf.mxu3  ;;  %v881_v38 = vadd.f32 %v2392_v42, %v728_v62  ;;  %v882_v42 = vadd.f32 %v2401_v48, %v729_v40  ;;  %v883_v48 = vadd.f32 %v2410_v56, %v730_v45 }
 0x189   :  { %v1312_v3 = vpop.f32.mrf.mxu2  ;;  %v982_v36 = vadd.f32 %v2390_v41, %v881_v38  ;;  %v983_v41 = vadd.f32 %v2398_v46, %v882_v42  ;;  %v984_v49 = vadd.f32 %v2407_v54, %v883_v48 }
 0x18a   :  { %v1332_v6 = vadd.f32 %v1312_v3, %v1231_v2  ;;  %v1060_v8 = vpop.f32.mrf.mxu0  ;;  %v1213_v63 = vpop.f32.mrf.mxu1 }
 0x18b   :  { %v1079_v37 = vadd.f32 %v1060_v8, %v978_v5 }
 0x18c   :  { %v1433_v10 = vadd.f32 %v1413_v0, %v1332_v6 }
 0x18d   :  { %v1232_v15 = vadd.f32 %v1213_v63, %v1079_v37 }
 0x18e   :  { %1441 = vst [vmem:[%s2456_s2] sm:$0xff] %v1433_v10 }
 0x18f   :  { %v1415_v12 = vpop.f32.mrf.mxu3 }
 0x191   :  { %v1314_v17 = vpop.f32.mrf.mxu2 }
 0x192   :  { %v1333_v18 = vadd.f32 %v1314_v17, %v1232_v15  ;;  %v1063_v19 = vpop.f32.mrf.mxu0  ;;  %v1216_v16 = vpop.f32.mrf.mxu1 }
 0x193   :  { %v1080_v23 = vadd.f32 %v1063_v19, %v979_v44 }
 0x194   :  { %v1434_v22 = vadd.f32 %v1415_v12, %v1333_v18 }
 0x195   :  { %v1233_v26 = vadd.f32 %v1216_v16, %v1080_v23 }
 0x196   :  { %1442 = vst [vmem:[%s2456_s2 + $0x8] sm:$0xff] %v1434_v22 }
 0x197   :  { %v1418_v24 = vpop.f32.mrf.mxu3 }
 0x199   :  { %v1317_v29 = vpop.f32.mrf.mxu2 }
 0x19a   :  { %v1334_v30 = vadd.f32 %v1317_v29, %v1233_v26  ;;  %v1065_v47 = vpop.f32.mrf.mxu0  ;;  %v1218_v27 = vpop.f32.mrf.mxu1 }
 0x19b   :  { %v1081_v55 = vadd.f32 %v1065_v47, %v980_v53 }
 0x19c   :  { %v1435_v52 = vadd.f32 %v1418_v24, %v1334_v30 }
 0x19d   :  { %v1234_v58 = vadd.f32 %v1218_v27, %v1081_v55 }
 0x19e   :  { %1443 = vst [vmem:[%s2456_s2 + $0x10] sm:$0xff] %v1435_v52 }
 0x19f   :  { %v1420_v33 = vpop.f32.mrf.mxu3 }
 0x1a1   :  { %v1319_v59 = vpop.f32.mrf.mxu2 }
 0x1a2   :  { %v1335_v34 = vadd.f32 %v1319_v59, %v1234_v58  ;;  %v1068_v32 = vpop.f32.mrf.mxu0  ;;  %v1221_v61 = vpop.f32.mrf.mxu1 }
 0x1a3   :  { %v1082_v28 = vadd.f32 %v1068_v32, %v981_v60 }
 0x1a4   :  { %v1436_v35 = vadd.f32 %v1420_v33, %v1335_v34 }
 0x1a5   :  { %v1235_v39 = vadd.f32 %v1221_v61, %v1082_v28 }
 0x1a6   :  { %1444 = vst [vmem:[%s2456_s2 + $0x18] sm:$0xff] %v1436_v35 }
 0x1a7   :  { %v1423_v0 = vpop.f32.mrf.mxu3 }
 0x1a9   :  { %v1322_v1 = vpop.f32.mrf.mxu2 }
 0x1aa   :  { %v1336_v2 = vadd.f32 %v1322_v1, %v1235_v39  ;;  %v1070_v3 = vpop.f32.mrf.mxu0  ;;  %v1223_v5 = vpop.f32.mrf.mxu1 }
 0x1ab   :  { %v1083_v8 = vadd.f32 %v1070_v3, %v982_v36 }
 0x1ac   :  { %v1437_v6 = vadd.f32 %v1423_v0, %v1336_v2 }
 0x1ad   :  { %v1236_v43 = vadd.f32 %v1223_v5, %v1083_v8 }
 0x1ae   :  { %1445 = vst [vmem:[%s2456_s2 + $0x20] sm:$0xff] %v1437_v6 }
 0x1af   :  { %v1425_v63 = vpop.f32.mrf.mxu3 }
 0x1b1   :  { %v1324_v9 = vpop.f32.mrf.mxu2 }
 0x1b2   :  { %v1337_v10 = vadd.f32 %v1324_v9, %v1236_v43  ;;  %v1073_v37 = vpop.f32.mrf.mxu0  ;;  %v1226_v14 = vpop.f32.mrf.mxu1 }
 0x1b3   :  { %v1084_v12 = vadd.f32 %v1073_v37, %v983_v41 }
 0x1b4   :  { %v1438_v11 = vadd.f32 %v1425_v63, %v1337_v10 }
 0x1b5   :  { %v1237_v15 = vadd.f32 %v1226_v14, %v1084_v12 }
 0x1b6   :  { %1446 = vst [vmem:[%s2456_s2 + $0x28] sm:$0xff] %v1438_v11 }
 0x1b7   :  { %v1428_v20 = vpop.f32.mrf.mxu3 }
 0x1b9   :  { %v1327_v17 = vpop.f32.mrf.mxu2 }
 0x1ba   :  { %v1338_v44 = vadd.f32 %v1327_v17, %v1237_v15  ;;  %v1075_v46 = vpop.f32.mrf.mxu0  ;;  %v1228_v50 = vpop.f32.mrf.mxu1 }
 0x1bb   :  { %v1085_v19 = vadd.f32 %v1075_v46, %v984_v49 }
 0x1bc   :  { %v1439_v18 = vadd.f32 %v1428_v20, %v1338_v44 }
 0x1bd   :  { %v1238_v16 = vadd.f32 %v1228_v50, %v1085_v19 }
 0x1be   :  { %1447 = vst [vmem:[%s2456_s2 + $0x30] sm:$0xff] %v1439_v18 }
 0x1bf   :  { %v1430_v22 = vpop.f32.mrf.mxu3 }
 0x1c1   :  { %v1329_v56 = vpop.f32.mrf.mxu2 }
 0x1c2   :  { %v1339_v21 = vadd.f32 %v1329_v56, %v1238_v16 }
 0x1c4   :  { %v1440_v23 = vadd.f32 %v1430_v22, %v1339_v21 }
 0x1c6   :  { %1448 = vst [vmem:[%s2456_s2 + $0x38] sm:$0xff] %v1440_v23 }
 0x1c7   :  { %1453 = vsyncpa [#allocation3], 1 }

</bundles_post_ra>
